<compile_context>
chip_gen: v6e
topology: v6e:2x2x1
jax: 0.10.0
libtpu: 0.0.40
codegen_flags: <defaults>
</compile_context>

<pallas_src>
import functools

import jax
import jax.numpy as jnp
from jax import lax
from jax.experimental import pallas as pl
from jax.experimental.pallas import tpu as pltpu


def _round_up(x, m):
    return (x + m - 1) // m * m


def _rnn_seq_kernel(xproj_ref, h0_ref, whh_ref, out_ref, h_scratch, *,
                    mxu_dtype, time_chunk, total_steps, mask_tail):
    """One grid step = `time_chunk` RNN-cell steps for one batch tile.

    Grid is (batch_tiles, n_chunks); the hidden state is carried across the
    time axis in the f32 VMEM scratch `h_scratch`.  W_hh / h0 have constant
    index maps so they stay VMEM-resident per batch tile.
    """
    c = pl.program_id(1)

    @pl.when(c == 0)
    def _init():
        h_scratch[...] = h0_ref[...].astype(jnp.float32)

    whh = whh_ref[...]                       # resident weight tile [Hp, Hp]

    def step(i, h):
        # xproj already contains x_t @ W_xh + b (hoisted out of the recurrence).
        xp = xproj_ref[i].astype(jnp.float32)           # [tb, Hp]
        y = xp + jnp.dot(h.astype(mxu_dtype), whh,
                         preferred_element_type=jnp.float32)
        h_new = jnp.maximum(y, 0.0)                     # ReLU in f32
        if mask_tail:
            # Padded tail steps (T % Tc != 0) must not touch the carried state.
            t = c * time_chunk + i
            h_new = jnp.where(t < total_steps, h_new, h)
        return h_new

    h = lax.fori_loop(0, time_chunk, step, h_scratch[...], unroll=True)
    h_scratch[...] = h

    @pl.when(c == pl.num_programs(1) - 1)
    def _finalize():
        out_ref[...] = h.astype(out_ref.dtype)


@functools.partial(jax.jit, static_argnames=("mxu_dtype", "time_chunk"))
def rnn_forward_seq(xs, h0, w_i2h, b_i2h, *, mxu_dtype=jnp.float32,
                    time_chunk=16):
    """Apply the RNN cell over a whole sequence in one kernel launch.

    xs:    [T, B, I]   per-step inputs
    h0:    [B, H]      initial hidden state
    w_i2h: [I + H, H]  cell weight, stored [in_features, out_features]
    b_i2h: [H] or [1, H]
    Returns the final hidden state [B, H] (== T repeated calls of forward()).
    """
    T, B, I = xs.shape
    H = h0.shape[1]
    assert w_i2h.shape == (I + H, H)
    b_i2h = jnp.reshape(b_i2h, (1, H))

    f32 = jnp.float32
    stream_dtype = f32 if mxu_dtype == f32 else jnp.bfloat16
    w_bytes = jnp.dtype(mxu_dtype).itemsize
    s_bytes = jnp.dtype(stream_dtype).itemsize

    # Split the fused weight: removes the in-kernel lane-axis concat entirely.
    w_xh = w_i2h[:I].astype(f32)             # [I, H]
    w_hh = w_i2h[I:]                         # [H, H]

    # ---- shape / tile selection (static, runs at trace time) -------------
    Hp = _round_up(H, 128)                   # lanes
    Bp8 = _round_up(B, 8)                    # sublanes
    # vreg-pressure guard: keep tb*Hp*4 (f32 working tile) <= ~128 KiB.
    cap = max(8, min(256, ((128 * 1024) // (Hp * 4)) // 8 * 8))
    tb = min(cap, Bp8)
    # Megacore (v7x): if the batch is big enough, force >= 2 batch tiles so the
    # "parallel" axis actually gives the second TensorCore work.
    if Bp8 >= 16 and Bp8 // tb < 2:
        tb = max(8, _round_up(Bp8 // 2, 8))
    Bp = _round_up(Bp8, tb)
    n_btiles = Bp // tb

    Tc = max(1, min(time_chunk, T))          # time-chunk (unrolled in-kernel)
    Tp = _round_up(T, Tc)
    n_chunks = Tp // Tc
    mask_tail = (Tp != T)

    # ---- hoisted x-projection: one big matmul, outside the recurrence ----
    xproj = xs.reshape(T * B, I).astype(f32) @ w_xh + b_i2h.astype(f32)
    xproj = xproj.reshape(T, B, H)
    # Padded hidden lanes get zero xproj and zero W_hh rows/cols, so padded
    # lanes of the hidden state stay exactly zero through the recurrence.
    xproj_p = jnp.zeros((Tp, Bp, Hp), stream_dtype).at[:T, :B, :H].set(
        xproj.astype(stream_dtype))
    h0_p = jnp.zeros((Bp, Hp), f32).at[:B, :H].set(h0.astype(f32))
    whh_p = jnp.zeros((Hp, Hp), mxu_dtype).at[:H, :H].set(
        w_hh.astype(mxu_dtype))

    # ---- VMEM budget (double buffers for streamed/resident blocks) -------
    need = (2 * Tc * tb * Hp * s_bytes       # streamed xproj chunk
            + 2 * tb * Hp * 4                # h0
            + 2 * Hp * Hp * w_bytes          # resident W_hh
            + 2 * tb * Hp * 4                # output tile
            + tb * Hp * 4)                   # carried-h scratch
    budget = 48 * 1024 * 1024                # safe on v5e/v6e/v7x (64 MiB phys)
    assert need <= budget, (
        f"RNN tile working set ({need} B) exceeds VMEM budget ({budget} B); "
        f"reduce hidden_size, batch tile or time_chunk, or use bf16 weights.")
    vmem_limit = int(min(max(int(need * 1.5), 32 * 1024 * 1024), budget))

    cost = pl.CostEstimate(
        flops=2 * T * Bp * Hp * Hp,
        transcendentals=0,
        bytes_accessed=(xproj_p.size * s_bytes + h0_p.size * 4
                        + whh_p.size * w_bytes + Bp * Hp * 4),
    )

    kernel = functools.partial(
        _rnn_seq_kernel, mxu_dtype=mxu_dtype, time_chunk=Tc,
        total_steps=T, mask_tail=mask_tail)

    out = pl.pallas_call(
        kernel,
        out_shape=jax.ShapeDtypeStruct((Bp, Hp), f32),
        grid_spec=pltpu.PrefetchScalarGridSpec(
            num_scalar_prefetch=0,
            grid=(n_btiles, n_chunks),            # time innermost, batch outer
            in_specs=[
                # xproj chunk: (Tc, tb, Hp), new block each (b, c)
                pl.BlockSpec((Tc, tb, Hp), lambda b, c: (c, b, 0)),
                # h0 tile: constant across the time axis
                pl.BlockSpec((tb, Hp), lambda b, c: (b, 0)),
                # W_hh: constant block index -> single HBM read, VMEM-resident
                pl.BlockSpec((Hp, Hp), lambda b, c: (0, 0)),
            ],
            out_specs=pl.BlockSpec((tb, Hp), lambda b, c: (b, 0)),
            scratch_shapes=[pltpu.VMEM((tb, Hp), jnp.float32)],  # carried h
        ),
        compiler_params=pltpu.CompilerParams(
            dimension_semantics=("parallel", "arbitrary"),
            vmem_limit_bytes=vmem_limit),
        cost_estimate=cost,
    )(xproj_p, h0_p, whh_p)

    return out[:B, :H]


def rnn_forward(x, h, w_i2h, b_i2h, *, mxu_dtype=jnp.float32):
    """Single cell step == RNNPytorch.forward(input, hidden)."""
    return rnn_forward_seq(x[None], h, w_i2h, b_i2h, mxu_dtype=mxu_dtype)


def init_params(key, input_size, hidden_size):
    """Deterministic init mirroring nn.Linear(input+hidden, hidden)."""
    k_w, k_b = jax.random.split(key)
    fan_in = input_size + hidden_size
    bound = 1.0 / (fan_in ** 0.5)
    w_i2h = jax.random.uniform(
        k_w, (fan_in, hidden_size), jnp.float32, minval=-bound, maxval=bound)
    b_i2h = jax.random.uniform(
        k_b, (1, hidden_size), jnp.float32, minval=-bound, maxval=bound)
    return w_i2h, b_i2h


if __name__ == "__main__":
    batch = 2
    input_size = 16
    hidden_size = 32
    seq_len = 8

    key = jax.random.PRNGKey(0)
    k_x, k_seq, k_p = jax.random.split(key, 3)

    w_i2h, b_i2h = init_params(k_p, input_size, hidden_size)

    # --- module forward() semantics: one cell step ---
    x = jax.random.normal(k_x, (batch, input_size), jnp.float32)
    h0 = jnp.zeros((batch, hidden_size), jnp.float32)            # initHidden()

    h1 = jax.block_until_ready(rnn_forward(x, h0, w_i2h, b_i2h))
    ref1 = jnp.maximum(jnp.concatenate([x, h0], axis=1) @ w_i2h + b_i2h, 0.0)
    assert h1.shape == (batch, hidden_size)
    assert jnp.allclose(h1, ref1, atol=1e-5), "single-step mismatch vs reference"

    # --- full recurrence (T steps) in one kernel launch ---
    xs = jax.random.normal(k_seq, (seq_len, batch, input_size), jnp.float32)
    hT = jax.block_until_ready(rnn_forward_seq(xs, h0, w_i2h, b_i2h))
    h_ref = h0
    for t in range(seq_len):
        h_ref = jnp.maximum(
            jnp.concatenate([xs[t], h_ref], axis=1) @ w_i2h + b_i2h, 0.0)
    assert jnp.allclose(hT, h_ref, atol=1e-4), "sequence mismatch vs reference"

    # --- ragged-time path: T not a multiple of the time chunk (tail masking) ---
    T_odd = 5
    hT5 = jax.block_until_ready(
        rnn_forward_seq(xs[:T_odd], h0, w_i2h, b_i2h, time_chunk=4))
    h_ref5 = h0
    for t in range(T_odd):
        h_ref5 = jnp.maximum(
            jnp.concatenate([xs[t], h_ref5], axis=1) @ w_i2h + b_i2h, 0.0)
    assert jnp.allclose(hT5, h_ref5, atol=1e-4), "ragged-time mismatch"

    # --- bf16 MXU-operand path (v6e / v7x recommendation), f32 accumulation ---
    hT_bf16 = jax.block_until_ready(
        rnn_forward_seq(xs, h0, w_i2h, b_i2h, mxu_dtype=jnp.bfloat16))
    assert jnp.allclose(hT_bf16, h_ref, atol=5e-2), "bf16 path mismatch"

    print("KERNEL_OK")
</pallas_src>

<mosaic_0001>
module attributes {stable_mosaic.version = 11 : i64} {
  func.func @_rnn_seq_kernel(%arg0: i32, %arg1: i32, %arg2: memref<1x8x128xf32, #tpu.memory_space<vmem>>, %arg3: memref<8x128xf32, #tpu.memory_space<vmem>>, %arg4: memref<128x128xf32, #tpu.memory_space<vmem>>, %arg5: memref<8x128xf32, #tpu.memory_space<vmem>>, %arg6: memref<8x128xf32, #tpu.memory_space<vmem>>) attributes {dimension_semantics = [#tpu.dimension_semantics<parallel>, #tpu.dimension_semantics<arbitrary>], iteration_bounds = array<i64: 1, 1>, scalar_prefetch = 0 : i64, scratch_operands = 1 : i64, tpu.core_type = #tpu.core_type<tc>, window_params = [{transform_indices = @transform_0, window_bounds = array<i64: 1, 8, 128>}, {transform_indices = @transform_1, window_bounds = array<i64: 8, 128>}, {pipeline_mode = #tpu.pipeline_mode<synchronous>, transform_indices = @transform_2, window_bounds = array<i64: 128, 128>}, {transform_indices = @transform_3, window_bounds = array<i64: 8, 128>}]} {
    %c0_i32 = arith.constant 0 : i32
    %0 = arith.cmpi eq, %arg1, %c0_i32 : i32
    %1 = arith.extui %0 : i1 to i32
    %c0_i32_0 = arith.constant 0 : i32
    %2 = arith.cmpi ne, %1, %c0_i32_0 : i32
    scf.if %2 {
      %c0_12 = arith.constant 0 : index
      %c0_13 = arith.constant 0 : index
      %16 = vector.load %arg3[%c0_12, %c0_13] : memref<8x128xf32, #tpu.memory_space<vmem>>, vector<8x128xf32>
      %c0_14 = arith.constant 0 : index
      %c0_15 = arith.constant 0 : index
      %17 = vector.load %arg6[%c0_14, %c0_15] : memref<8x128xf32, #tpu.memory_space<vmem>>, vector<8x128xf32>
      tpu.vector_store %arg6[%c0_14, %c0_15], %16 {strides = array<i32>} : memref<8x128xf32, #tpu.memory_space<vmem>>, vector<8x128xf32>,
    } else {
    }
    %c0 = arith.constant 0 : index
    %c0_1 = arith.constant 0 : index
    %3 = vector.load %arg4[%c0, %c0_1] : memref<128x128xf32, #tpu.memory_space<vmem>>, vector<128x128xf32>
    %c0_2 = arith.constant 0 : index
    %c0_3 = arith.constant 0 : index
    %4 = vector.load %arg6[%c0_2, %c0_3] : memref<8x128xf32, #tpu.memory_space<vmem>>, vector<8x128xf32>
    %c0_i32_4 = arith.constant 0 : i32
    %5 = arith.index_cast %c0_i32_4 : i32 to index
    %c0_5 = arith.constant 0 : index
    %c0_6 = arith.constant 0 : index
    %6 = vector.load %arg2[%5, %c0_5, %c0_6] : memref<1x8x128xf32, #tpu.memory_space<vmem>>, vector<1x8x128xf32>
    %7 = vector.shape_cast %6 : vector<1x8x128xf32> to vector<8x128xf32>
    %cst = arith.constant dense<0.000000e+00> : vector<8x128xf32>
    %8 = tpu.matmul %4, %3, %cst {dimension_numbers = #tpu.dot_dimension_numbers<[1], [0], [0], [1], [0, 0, 1, 1], [], []>} : vector<8x128xf32>, vector<128x128xf32>, vector<8x128xf32> -> vector<8x128xf32>
    %9 = arith.addf %7, %8 : vector<8x128xf32>
    %cst_7 = arith.constant 0.000000e+00 : f32
    %10 = vector.broadcast %cst_7 : f32 to vector<8x128xf32>
    %11 = arith.maximumf %9, %10 : vector<8x128xf32>
    %c1_i32 = arith.constant 1 : i32
    %c0_8 = arith.constant 0 : index
    %c0_9 = arith.constant 0 : index
    %12 = vector.load %arg6[%c0_8, %c0_9] : memref<8x128xf32, #tpu.memory_space<vmem>>, vector<8x128xf32>
    tpu.vector_store %arg6[%c0_8, %c0_9], %11 {strides = array<i32>} : memref<8x128xf32, #tpu.memory_space<vmem>>, vector<8x128xf32>,
    %c0_i32_10 = arith.constant 0 : i32
    %13 = arith.cmpi eq, %arg1, %c0_i32_10 : i32
    %14 = arith.extui %13 : i1 to i32
    %c0_i32_11 = arith.constant 0 : i32
    %15 = arith.cmpi ne, %14, %c0_i32_11 : i32
    scf.if %15 {
      %c0_12 = arith.constant 0 : index
      %c0_13 = arith.constant 0 : index
      %16 = vector.load %arg5[%c0_12, %c0_13] : memref<8x128xf32, #tpu.memory_space<vmem>>, vector<8x128xf32>
      tpu.vector_store %arg5[%c0_12, %c0_13], %11 {strides = array<i32>} : memref<8x128xf32, #tpu.memory_space<vmem>>, vector<8x128xf32>,
    } else {
    }
    return
  }
  func.func @transform_0(%arg0: i32, %arg1: i32) -> (i32, i32, i32) {
    %c0_i32 = arith.constant 0 : i32
    %c0_i32_0 = arith.constant 0 : i32
    return %arg1, %arg0, %c0_i32 : i32, i32, i32
  }
  func.func @transform_1(%arg0: i32, %arg1: i32) -> (i32, i32) {
    %c0_i32 = arith.constant 0 : i32
    %c0_i32_0 = arith.constant 0 : i32
    return %arg0, %c0_i32 : i32, i32
  }
  func.func @transform_2(%arg0: i32, %arg1: i32) -> (i32, i32) {
    %c0_i32 = arith.constant 0 : i32
    %c0_i32_0 = arith.constant 0 : i32
    %c0_i32_1 = arith.constant 0 : i32
    return %c0_i32, %c0_i32_0 : i32, i32
  }
  func.func @transform_3(%arg0: i32, %arg1: i32) -> (i32, i32) {
    %c0_i32 = arith.constant 0 : i32
    %c0_i32_0 = arith.constant 0 : i32
    return %arg0, %c0_i32 : i32, i32
  }
}

</mosaic_0001>

<bundles_post_ra>
// kernel: rnn_forward_seq.1
= control target key start
LH: loop header
LB: loop body
LE: loop exit
PB: predicated region body
PF: predicated region fallthrough
CT: control target
= control target key end

     0   :  { %v173_v0 = vmov 0.0   ;;  %vm174_vm0 = vmmov 0   ;;  %s252_s2 = inlined_call_operand.vmem [shape: f32[128,128], index: 2, kind: input, shape index: {}]   ;;  %s253_s1 = inlined_call_operand.vmem [shape: f32[8,128], index: 1, kind: input, shape index: {}]   ;;  %s254_s0 = inlined_call_operand.vmem [shape: f32[1,8,128], index: 0, kind: input, shape index: {}]   ;;  %s255_s3 = inlined_call_operand.vmem [shape: f32[8,128], index: 3, kind: output, shape index: {}]  }
   0x1   :  { %136 = vmatprep.subr.mxu0 %v173_v0  ;;  %v35_v1 = vld [vmem:[%s252_s2 + $0x78] sm:$0xff]  ;;  %v34_v2 = vld [vmem:[%s252_s2 + $0x70] sm:$0xff]  ;;  %168 = vmatprep.mubr.msk.f32.mxu0 %vm174_vm0, %v173_v0  ;;  %v33_v3 = vld [vmem:[%s252_s2 + $0x68] sm:$0xff] }
   0x2   :  { %137 = vmatpush3.msra.mxu0 %v35_v1  ;;  %v32_v4 = vld [vmem:[%s252_s2 + $0x60] sm:$0xff]  ;;  %v31_v5 = vld [vmem:[%s252_s2 + $0x58] sm:$0xff]  ;;  %v30_v6 = vld [vmem:[%s252_s2 + $0x50] sm:$0xff] }
   0x3   :  { %138 = vmatprep.subr.mxu0 %v173_v0  ;;  %v29_v7 = vld [vmem:[%s252_s2 + $0x48] sm:$0xff]  ;;  %v28_v8 = vld [vmem:[%s252_s2 + $0x40] sm:$0xff]  ;;  %v27_v9 = vld [vmem:[%s252_s2 + $0x38] sm:$0xff] }
   0x4   :  { %139 = vmatpush3.msra.mxu0 %v34_v2  ;;  %v26_v10 = vld [vmem:[%s252_s2 + $0x30] sm:$0xff]  ;;  %v25_v11 = vld [vmem:[%s252_s2 + $0x28] sm:$0xff]  ;;  %v24_v12 = vld [vmem:[%s252_s2 + $0x20] sm:$0xff] }
   0x5   :  { %140 = vmatprep.subr.mxu0 %v173_v0  ;;  %v23_v13 = vld [vmem:[%s252_s2 + $0x18] sm:$0xff]  ;;  %v22_v14 = vld [vmem:[%s252_s2 + $0x10] sm:$0xff]  ;;  %v21_v15 = vld [vmem:[%s252_s2 + $0x8] sm:$0xff] }
   0x6   :  { %141 = vmatpush3.msra.mxu0 %v33_v3  ;;  %v20_v16 = vld [vmem:[%s252_s2] sm:$0xff] }
   0x7   :  { %142 = vmatprep.subr.mxu0 %v173_v0  ;;  %v18_v17 = vld [vmem:[%s253_s1] sm:$0xff] }
   0x8   :  { %143 = vmatpush3.msra.mxu0 %v32_v4  ;;  %v37_v18 = vld [vmem:[%s254_s0] sm:$0xff] }
   0x9   :  { %144 = vmatprep.subr.mxu0 %v173_v0 }
   0xa   :  { %145 = vmatpush3.msra.mxu0 %v31_v5 }
   0xb   :  { %146 = vmatprep.subr.mxu0 %v173_v0 }
   0xc   :  { %147 = vmatpush3.msra.mxu0 %v30_v6 }
   0xd   :  { %148 = vmatprep.subr.mxu0 %v173_v0 }
   0xe   :  { %149 = vmatpush3.msra.mxu0 %v29_v7 }
   0xf   :  { %150 = vmatprep.subr.mxu0 %v173_v0 }
  0x10   :  { %151 = vmatpush3.msra.mxu0 %v28_v8 }
  0x11   :  { %152 = vmatprep.subr.mxu0 %v173_v0 }
  0x12   :  { %153 = vmatpush3.msra.mxu0 %v27_v9 }
  0x13   :  { %154 = vmatprep.subr.mxu0 %v173_v0 }
  0x14   :  { %155 = vmatpush3.msra.mxu0 %v26_v10 }
  0x15   :  { %156 = vmatprep.subr.mxu0 %v173_v0 }
  0x16   :  { %157 = vmatpush3.msra.mxu0 %v25_v11 }
  0x17   :  { %158 = vmatprep.subr.mxu0 %v173_v0 }
  0x18   :  { %159 = vmatpush3.msra.mxu0 %v24_v12 }
  0x19   :  { %160 = vmatprep.subr.mxu0 %v173_v0 }
  0x1a   :  { %161 = vmatpush3.msra.mxu0 %v23_v13 }
  0x1b   :  { %162 = vmatprep.subr.mxu0 %v173_v0 }
  0x1c   :  { %163 = vmatpush3.msra.mxu0 %v22_v14 }
  0x1d   :  { %164 = vmatprep.subr.mxu0 %v173_v0 }
  0x1e   :  { %165 = vmatpush3.msra.mxu0 %v21_v15 }
  0x1f   :  { %166 = vmatprep.subr.mxu0 %v173_v0 }
  0x20   :  { %167 = vmatpush3.msra.mxu0 %v20_v16 }
  0x21   :  { %169 = vmatmul.mubr.f32.vlgmr.msra.gmra.mxu0 %v18_v17 }
  0xe1   :  { %v104_v19 = vpop.f32.mrf.mxu0 }
  0xe2   :  { %v108_v20 = vadd.f32 %v104_v19, %v37_v18 }
  0xe3   :  { %v170_v21 = vpop.f32.mrf.mxu0 }
  0xe4   :  { %v109_v22 = vmax.f32 %v108_v20, 0.0 }
  0xe6   :  { %114 = vst [vmem:[%s255_s3] sm:$0xff] %v109_v22 }

</bundles_post_ra>
